<compile_context>
chip_gen: v7x
topology: tpu7x:2x2x1
jax: 0.10.0
libtpu: 0.0.40
codegen_flags: <defaults>
</compile_context>

<pallas_src>
import jax
import jax.numpy as jnp
from jax import lax
from jax.experimental import pallas as pl
from jax.experimental.pallas import tpu as pltpu

EPS = 1e-5          # InstanceNorm default eps
NEG_SLOPE = 0.01    # LeakyReLU default negative_slope


def _norm_act(h):
    """InstanceNorm(affine=False) over the pixel (lane) axis + LeakyReLU.

    Single-pass statistics: var = E[h^2] - E[h]^2, all in f32.
    """
    inv_n = 1.0 / h.shape[-1]
    mean = jnp.sum(h, axis=-1, keepdims=True) * inv_n
    ex2 = jnp.sum(h * h, axis=-1, keepdims=True) * inv_n
    var = jnp.maximum(ex2 - mean * mean, 0.0)
    h = (h - mean) * lax.rsqrt(var + EPS)
    return jnp.where(h >= 0, h, NEG_SLOPE * h)


def decoder_kernel(x_ref, w1_ref, w2_ref, w3_ref, w4_ref, b4_ref, out_ref):
    """One grid step = one batch sample.

    x_ref:   (Cin, P)   bf16   channels on sublanes, pixels on lanes
    w*_ref:  (Cout, Cin) bf16  1x1-conv weights (torch layout, kernel dims squeezed)
    b4_ref:  (NC, 1)    f32    final conv bias (b1..b3 cancel under InstanceNorm)
    out_ref: (NC, P)    f32
    """
    # mlp[0:4]: Conv1x1 -> InstanceNorm -> LeakyReLU -> Dropout(identity)
    h = jnp.dot(w1_ref[...], x_ref[...], preferred_element_type=jnp.float32)
    h = _norm_act(h)
    # mlp[4:8]
    h = jnp.dot(w2_ref[...], h.astype(jnp.bfloat16),
                preferred_element_type=jnp.float32)
    h = _norm_act(h)
    # fuse_features -> norm -> act -> Dropout(identity)
    h = jnp.dot(w3_ref[...], h.astype(jnp.bfloat16),
                preferred_element_type=jnp.float32)
    h = _norm_act(h)
    # final_conv (bias kept: it is NOT followed by a norm)
    out = jnp.dot(w4_ref[...], h.astype(jnp.bfloat16),
                  preferred_element_type=jnp.float32)
    out_ref[...] = out + b4_ref[...]


def channel_mixer_decoder(x_list, params, target_image_size):
    """x_list: list of NCHW float32 arrays, all already at target_image_size."""
    # TODO(synk): bicubic upsample branch (inputs not at target size), the 3D
    # (b, seq, feat) path (rescale_conv / spatial_mixer) and train-mode
    # Dropout2d are not exercised / implemented.
    for x in x_list:
        assert x.shape[-1] == target_image_size and x.shape[-2] == target_image_size
    x = jnp.concatenate(x_list, axis=1)                    # (B, Cin, H, W)
    B, Cin, H, W = x.shape
    P = H * W
    x = x.reshape(B, Cin, P).astype(jnp.bfloat16)          # reshape only, no transpose

    w1, _b1, w2, _b2, w3, _b3, w4, b4 = params             # b1..b3 cancel pre-norm
    w1 = w1.astype(jnp.bfloat16)
    w2 = w2.astype(jnp.bfloat16)
    w3 = w3.astype(jnp.bfloat16)
    w4 = w4.astype(jnp.bfloat16)
    b4 = b4.astype(jnp.float32)
    NBH = w1.shape[0]
    HID = w3.shape[0]
    NC = w4.shape[0]

    # TODO(synk): for very large target_image_size (P >> 64k) the whole-image
    # block should be P-tiled with two-pass statistics to stay inside v7x's
    # 64 MiB VMEM; toy/typical sizes fit comfortably under the limit below.
    out = pl.pallas_call(
        decoder_kernel,
        out_shape=jax.ShapeDtypeStruct((B, NC, P), jnp.float32),
        grid_spec=pltpu.PrefetchScalarGridSpec(
            num_scalar_prefetch=0,
            grid=(B,),
            in_specs=[
                pl.BlockSpec((None, Cin, P), lambda b: (b, 0, 0)),
                pl.BlockSpec((NBH, Cin), lambda b: (0, 0)),
                pl.BlockSpec((NBH, NBH), lambda b: (0, 0)),
                pl.BlockSpec((HID, NBH), lambda b: (0, 0)),
                pl.BlockSpec((NC, HID), lambda b: (0, 0)),
                pl.BlockSpec((NC, 1), lambda b: (0, 0)),
            ],
            out_specs=pl.BlockSpec((None, NC, P), lambda b: (b, 0, 0)),
        ),
        compiler_params=pltpu.CompilerParams(
            dimension_semantics=("parallel",),          # batch across TCs (v7x)
            vmem_limit_bytes=48 * 1024 * 1024,
        ),
    )(x, w1, w2, w3, w4, b4)

    # (B, NC, P) -> (B, num_classes, H, W): pure reshape, matches torch NCHW.
    return out.reshape(B, NC, target_image_size, target_image_size)


def reference(x_list, params, target_image_size):
    """Pure-JAX reference of the same forward pass (keeps b1..b3 to verify the
    kernel's bias elision; mirrors the kernel's bf16 matmul inputs)."""
    x = jnp.concatenate(x_list, axis=1)
    B, Cin, H, W = x.shape
    x = x.reshape(B, Cin, H * W)
    w1, b1, w2, b2, w3, b3, w4, b4 = params

    def conv1x1(h, w, b):   # h: (B, C, P); w: (Cout, C); b: (Cout, 1)
        y = jnp.einsum('oc,bcp->bop', w.astype(jnp.bfloat16),
                       h.astype(jnp.bfloat16),
                       preferred_element_type=jnp.float32)
        return y + b

    def inorm(h):           # centered-form InstanceNorm over pixels
        m = jnp.mean(h, axis=-1, keepdims=True)
        v = jnp.mean(jnp.square(h - m), axis=-1, keepdims=True)
        return (h - m) / jnp.sqrt(v + EPS)

    def lrelu(h):
        return jnp.where(h >= 0, h, NEG_SLOPE * h)

    h = lrelu(inorm(conv1x1(x, w1, b1)))
    h = lrelu(inorm(conv1x1(h, w2, b2)))
    h = lrelu(inorm(conv1x1(h, w3, b3)))
    out = conv1x1(h, w4, b4)
    return out.reshape(B, -1, target_image_size, target_image_size)


def init_params(key, cin, nbh, hidden, num_classes):
    """Deterministic 1x1-conv params: weights (Cout, Cin), biases (Cout, 1)."""
    ks = jax.random.split(key, 8)

    def w(k, i, o):
        bound = 1.0 / jnp.sqrt(i)
        return jax.random.uniform(k, (o, i), jnp.float32, -bound, bound)

    def bias(k, i, o):
        bound = 1.0 / jnp.sqrt(i)
        return jax.random.uniform(k, (o, 1), jnp.float32, -bound, bound)

    return (
        w(ks[0], cin, nbh),            bias(ks[1], cin, nbh),
        w(ks[2], nbh, nbh),            bias(ks[3], nbh, nbh),
        w(ks[4], nbh, hidden),         bias(ks[5], nbh, hidden),
        w(ks[6], hidden, num_classes), bias(ks[7], hidden, num_classes),
    )


if __name__ == "__main__":
    # Small config: 2 input feature maps (num_blocks = 2), already at target size.
    B = 2
    C_PER_INPUT = 4
    TARGET = 16
    HIDDEN = 32
    NUM_CLASSES = 5
    NUM_BLOCKS = 2
    NBH = NUM_BLOCKS * HIDDEN
    CIN = NUM_BLOCKS * C_PER_INPUT

    key = jax.random.PRNGKey(0)
    k_x0, k_x1, k_p = jax.random.split(key, 3)
    x0 = jax.random.normal(k_x0, (B, C_PER_INPUT, TARGET, TARGET), jnp.float32)
    x1 = jax.random.normal(k_x1, (B, C_PER_INPUT, TARGET, TARGET), jnp.float32)
    params = init_params(k_p, CIN, NBH, HIDDEN, NUM_CLASSES)

    out = channel_mixer_decoder([x0, x1], params, TARGET)
    out = jax.block_until_ready(out)
    assert out.shape == (B, NUM_CLASSES, TARGET, TARGET), out.shape

    ref = jax.block_until_ready(reference([x0, x1], params, TARGET))
    assert jnp.allclose(out, ref, atol=1e-2, rtol=1e-2), \
        float(jnp.max(jnp.abs(out - ref)))

    print("KERNEL_OK")
</pallas_src>

<mosaic_0001>
module attributes {stable_mosaic.version = 11 : i64} {
  func.func @decoder_kernel(%arg0: i32, %arg1: memref<1x8x256xbf16, #tpu.memory_space<vmem>>, %arg2: memref<64x8xbf16, #tpu.memory_space<vmem>>, %arg3: memref<64x64xbf16, #tpu.memory_space<vmem>>, %arg4: memref<32x64xbf16, #tpu.memory_space<vmem>>, %arg5: memref<5x32xbf16, #tpu.memory_space<vmem>>, %arg6: memref<5x1xf32, #tpu.memory_space<vmem>>, %arg7: memref<1x5x256xf32, #tpu.memory_space<vmem>>) attributes {dimension_semantics = [#tpu.dimension_semantics<parallel>], iteration_bounds = array<i64: 2>, scalar_prefetch = 0 : i64, scratch_operands = 0 : i64, tpu.core_type = #tpu.core_type<tc>, window_params = [{transform_indices = @transform_0, window_bounds = array<i64: 1, 8, 256>}, {pipeline_mode = #tpu.pipeline_mode<synchronous>, transform_indices = @transform_1, window_bounds = array<i64: 64, 8>}, {pipeline_mode = #tpu.pipeline_mode<synchronous>, transform_indices = @transform_2, window_bounds = array<i64: 64, 64>}, {pipeline_mode = #tpu.pipeline_mode<synchronous>, transform_indices = @transform_3, window_bounds = array<i64: 32, 64>}, {pipeline_mode = #tpu.pipeline_mode<synchronous>, transform_indices = @transform_4, window_bounds = array<i64: 5, 32>}, {pipeline_mode = #tpu.pipeline_mode<synchronous>, transform_indices = @transform_5, window_bounds = array<i64: 5, 1>}, {transform_indices = @transform_6, window_bounds = array<i64: 1, 5, 256>}]} {
    %c0 = arith.constant 0 : index
    %c0_0 = arith.constant 0 : index
    %0 = vector.load %arg2[%c0, %c0_0] : memref<64x8xbf16, #tpu.memory_space<vmem>>, vector<64x8xbf16>
    %c0_1 = arith.constant 0 : index
    %c0_2 = arith.constant 0 : index
    %c0_3 = arith.constant 0 : index
    %1 = vector.load %arg1[%c0_1, %c0_2, %c0_3] : memref<1x8x256xbf16, #tpu.memory_space<vmem>>, vector<1x8x256xbf16>
    %2 = vector.shape_cast %1 : vector<1x8x256xbf16> to vector<8x256xbf16>
    %cst = arith.constant dense<0.000000e+00> : vector<64x256xf32>
    %3 = tpu.matmul %0, %2, %cst {dimension_numbers = #tpu.dot_dimension_numbers<[1], [0], [0], [1], [0, 0, 1, 1], [], []>} : vector<64x8xbf16>, vector<8x256xbf16>, vector<64x256xf32> -> vector<64x256xf32>
    %cst_4 = arith.constant dense<0.000000e+00> : vector<64xf32>
    %4 = vector.multi_reduction <add>, %3, %cst_4 [1] : vector<64x256xf32> to vector<64xf32>
    %5 = vector.shape_cast %4 : vector<64xf32> to vector<64x1xf32>
    %cst_5 = arith.constant 3.906250e-03 : f32
    %6 = vector.broadcast %cst_5 : f32 to vector<64x1xf32>
    %7 = arith.mulf %5, %6 : vector<64x1xf32>
    %8 = arith.mulf %3, %3 : vector<64x256xf32>
    %cst_6 = arith.constant dense<0.000000e+00> : vector<64xf32>
    %9 = vector.multi_reduction <add>, %8, %cst_6 [1] : vector<64x256xf32> to vector<64xf32>
    %10 = vector.shape_cast %9 : vector<64xf32> to vector<64x1xf32>
    %cst_7 = arith.constant 3.906250e-03 : f32
    %11 = vector.broadcast %cst_7 : f32 to vector<64x1xf32>
    %12 = arith.mulf %10, %11 : vector<64x1xf32>
    %13 = arith.mulf %7, %7 : vector<64x1xf32>
    %14 = arith.subf %12, %13 : vector<64x1xf32>
    %cst_8 = arith.constant 0.000000e+00 : f32
    %15 = vector.broadcast %cst_8 : f32 to vector<64x1xf32>
    %16 = arith.maximumf %14, %15 : vector<64x1xf32>
    %17 = vector.broadcast %7 : vector<64x1xf32> to vector<64x256xf32>
    %18 = arith.subf %3, %17 : vector<64x256xf32>
    %cst_9 = arith.constant 9.99999974E-6 : f32
    %19 = vector.broadcast %cst_9 : f32 to vector<64x1xf32>
    %20 = arith.addf %16, %19 : vector<64x1xf32>
    %21 = math.rsqrt %20 : vector<64x1xf32>
    %22 = vector.broadcast %21 : vector<64x1xf32> to vector<64x256xf32>
    %23 = arith.mulf %18, %22 : vector<64x256xf32>
    %cst_10 = arith.constant 0.000000e+00 : f32
    %24 = vector.broadcast %cst_10 : f32 to vector<64x256xf32>
    %25 = arith.cmpf oge, %23, %24 : vector<64x256xf32>
    %cst_11 = arith.constant 0.00999999977 : f32
    %26 = vector.broadcast %cst_11 : f32 to vector<64x256xf32>
    %27 = arith.mulf %26, %23 : vector<64x256xf32>
    %28 = arith.select %25, %23, %27 : vector<64x256xi1>, vector<64x256xf32>
    %c0_12 = arith.constant 0 : index
    %c0_13 = arith.constant 0 : index
    %29 = vector.load %arg3[%c0_12, %c0_13] : memref<64x64xbf16, #tpu.memory_space<vmem>>, vector<64x64xbf16>
    %30 = arith.truncf %28 : vector<64x256xf32> to vector<64x256xbf16>
    %cst_14 = arith.constant dense<0.000000e+00> : vector<64x256xf32>
    %31 = tpu.matmul %29, %30, %cst_14 {dimension_numbers = #tpu.dot_dimension_numbers<[1], [0], [0], [1], [0, 0, 1, 1], [], []>} : vector<64x64xbf16>, vector<64x256xbf16>, vector<64x256xf32> -> vector<64x256xf32>
    %cst_15 = arith.constant dense<0.000000e+00> : vector<64xf32>
    %32 = vector.multi_reduction <add>, %31, %cst_15 [1] : vector<64x256xf32> to vector<64xf32>
    %33 = vector.shape_cast %32 : vector<64xf32> to vector<64x1xf32>
    %cst_16 = arith.constant 3.906250e-03 : f32
    %34 = vector.broadcast %cst_16 : f32 to vector<64x1xf32>
    %35 = arith.mulf %33, %34 : vector<64x1xf32>
    %36 = arith.mulf %31, %31 : vector<64x256xf32>
    %cst_17 = arith.constant dense<0.000000e+00> : vector<64xf32>
    %37 = vector.multi_reduction <add>, %36, %cst_17 [1] : vector<64x256xf32> to vector<64xf32>
    %38 = vector.shape_cast %37 : vector<64xf32> to vector<64x1xf32>
    %cst_18 = arith.constant 3.906250e-03 : f32
    %39 = vector.broadcast %cst_18 : f32 to vector<64x1xf32>
    %40 = arith.mulf %38, %39 : vector<64x1xf32>
    %41 = arith.mulf %35, %35 : vector<64x1xf32>
    %42 = arith.subf %40, %41 : vector<64x1xf32>
    %cst_19 = arith.constant 0.000000e+00 : f32
    %43 = vector.broadcast %cst_19 : f32 to vector<64x1xf32>
    %44 = arith.maximumf %42, %43 : vector<64x1xf32>
    %45 = vector.broadcast %35 : vector<64x1xf32> to vector<64x256xf32>
    %46 = arith.subf %31, %45 : vector<64x256xf32>
    %cst_20 = arith.constant 9.99999974E-6 : f32
    %47 = vector.broadcast %cst_20 : f32 to vector<64x1xf32>
    %48 = arith.addf %44, %47 : vector<64x1xf32>
    %49 = math.rsqrt %48 : vector<64x1xf32>
    %50 = vector.broadcast %49 : vector<64x1xf32> to vector<64x256xf32>
    %51 = arith.mulf %46, %50 : vector<64x256xf32>
    %cst_21 = arith.constant 0.000000e+00 : f32
    %52 = vector.broadcast %cst_21 : f32 to vector<64x256xf32>
    %53 = arith.cmpf oge, %51, %52 : vector<64x256xf32>
    %cst_22 = arith.constant 0.00999999977 : f32
    %54 = vector.broadcast %cst_22 : f32 to vector<64x256xf32>
    %55 = arith.mulf %54, %51 : vector<64x256xf32>
    %56 = arith.select %53, %51, %55 : vector<64x256xi1>, vector<64x256xf32>
    %c0_23 = arith.constant 0 : index
    %c0_24 = arith.constant 0 : index
    %57 = vector.load %arg4[%c0_23, %c0_24] : memref<32x64xbf16, #tpu.memory_space<vmem>>, vector<32x64xbf16>
    %58 = arith.truncf %56 : vector<64x256xf32> to vector<64x256xbf16>
    %cst_25 = arith.constant dense<0.000000e+00> : vector<32x256xf32>
    %59 = tpu.matmul %57, %58, %cst_25 {dimension_numbers = #tpu.dot_dimension_numbers<[1], [0], [0], [1], [0, 0, 1, 1], [], []>} : vector<32x64xbf16>, vector<64x256xbf16>, vector<32x256xf32> -> vector<32x256xf32>
    %cst_26 = arith.constant dense<0.000000e+00> : vector<32xf32>
    %60 = vector.multi_reduction <add>, %59, %cst_26 [1] : vector<32x256xf32> to vector<32xf32>
    %61 = vector.shape_cast %60 : vector<32xf32> to vector<32x1xf32>
    %cst_27 = arith.constant 3.906250e-03 : f32
    %62 = vector.broadcast %cst_27 : f32 to vector<32x1xf32>
    %63 = arith.mulf %61, %62 : vector<32x1xf32>
    %64 = arith.mulf %59, %59 : vector<32x256xf32>
    %cst_28 = arith.constant dense<0.000000e+00> : vector<32xf32>
    %65 = vector.multi_reduction <add>, %64, %cst_28 [1] : vector<32x256xf32> to vector<32xf32>
    %66 = vector.shape_cast %65 : vector<32xf32> to vector<32x1xf32>
    %cst_29 = arith.constant 3.906250e-03 : f32
    %67 = vector.broadcast %cst_29 : f32 to vector<32x1xf32>
    %68 = arith.mulf %66, %67 : vector<32x1xf32>
    %69 = arith.mulf %63, %63 : vector<32x1xf32>
    %70 = arith.subf %68, %69 : vector<32x1xf32>
    %cst_30 = arith.constant 0.000000e+00 : f32
    %71 = vector.broadcast %cst_30 : f32 to vector<32x1xf32>
    %72 = arith.maximumf %70, %71 : vector<32x1xf32>
    %73 = vector.broadcast %63 : vector<32x1xf32> to vector<32x256xf32>
    %74 = arith.subf %59, %73 : vector<32x256xf32>
    %cst_31 = arith.constant 9.99999974E-6 : f32
    %75 = vector.broadcast %cst_31 : f32 to vector<32x1xf32>
    %76 = arith.addf %72, %75 : vector<32x1xf32>
    %77 = math.rsqrt %76 : vector<32x1xf32>
    %78 = vector.broadcast %77 : vector<32x1xf32> to vector<32x256xf32>
    %79 = arith.mulf %74, %78 : vector<32x256xf32>
    %cst_32 = arith.constant 0.000000e+00 : f32
    %80 = vector.broadcast %cst_32 : f32 to vector<32x256xf32>
    %81 = arith.cmpf oge, %79, %80 : vector<32x256xf32>
    %cst_33 = arith.constant 0.00999999977 : f32
    %82 = vector.broadcast %cst_33 : f32 to vector<32x256xf32>
    %83 = arith.mulf %82, %79 : vector<32x256xf32>
    %84 = arith.select %81, %79, %83 : vector<32x256xi1>, vector<32x256xf32>
    %c0_34 = arith.constant 0 : index
    %c0_35 = arith.constant 0 : index
    %85 = vector.load %arg5[%c0_34, %c0_35] : memref<5x32xbf16, #tpu.memory_space<vmem>>, vector<5x32xbf16>
    %86 = arith.truncf %84 : vector<32x256xf32> to vector<32x256xbf16>
    %cst_36 = arith.constant dense<0.000000e+00> : vector<5x256xf32>
    %87 = tpu.matmul %85, %86, %cst_36 {dimension_numbers = #tpu.dot_dimension_numbers<[1], [0], [0], [1], [0, 0, 1, 1], [], []>} : vector<5x32xbf16>, vector<32x256xbf16>, vector<5x256xf32> -> vector<5x256xf32>
    %c0_37 = arith.constant 0 : index
    %c0_38 = arith.constant 0 : index
    %88 = vector.load %arg6[%c0_37, %c0_38] : memref<5x1xf32, #tpu.memory_space<vmem>>, vector<5x1xf32>
    %89 = vector.broadcast %88 : vector<5x1xf32> to vector<5x256xf32>
    %90 = arith.addf %87, %89 : vector<5x256xf32>
    %c0_39 = arith.constant 0 : index
    %c0_40 = arith.constant 0 : index
    %c0_41 = arith.constant 0 : index
    %91 = vector.load %arg7[%c0_39, %c0_40, %c0_41] : memref<1x5x256xf32, #tpu.memory_space<vmem>>, vector<1x5x256xf32>
    %92 = vector.shape_cast %91 : vector<1x5x256xf32> to vector<5x256xf32>
    %93 = vector.shape_cast %90 : vector<5x256xf32> to vector<1x5x256xf32>
    tpu.vector_store %arg7[%c0_39, %c0_40, %c0_41], %93 {strides = array<i32>} : memref<1x5x256xf32, #tpu.memory_space<vmem>>, vector<1x5x256xf32>,
    return
  }
  func.func @transform_0(%arg0: i32) -> (i32, i32, i32) {
    %c0_i32 = arith.constant 0 : i32
    %c0_i32_0 = arith.constant 0 : i32
    %c0_i32_1 = arith.constant 0 : i32
    return %arg0, %c0_i32, %c0_i32_0 : i32, i32, i32
  }
  func.func @transform_1(%arg0: i32) -> (i32, i32) {
    %c0_i32 = arith.constant 0 : i32
    %c0_i32_0 = arith.constant 0 : i32
    %c0_i32_1 = arith.constant 0 : i32
    return %c0_i32, %c0_i32_0 : i32, i32
  }
  func.func @transform_2(%arg0: i32) -> (i32, i32) {
    %c0_i32 = arith.constant 0 : i32
    %c0_i32_0 = arith.constant 0 : i32
    %c0_i32_1 = arith.constant 0 : i32
    return %c0_i32, %c0_i32_0 : i32, i32
  }
  func.func @transform_3(%arg0: i32) -> (i32, i32) {
    %c0_i32 = arith.constant 0 : i32
    %c0_i32_0 = arith.constant 0 : i32
    %c0_i32_1 = arith.constant 0 : i32
    return %c0_i32, %c0_i32_0 : i32, i32
  }
  func.func @transform_4(%arg0: i32) -> (i32, i32) {
    %c0_i32 = arith.constant 0 : i32
    %c0_i32_0 = arith.constant 0 : i32
    %c0_i32_1 = arith.constant 0 : i32
    return %c0_i32, %c0_i32_0 : i32, i32
  }
  func.func @transform_5(%arg0: i32) -> (i32, i32) {
    %c0_i32 = arith.constant 0 : i32
    %c0_i32_0 = arith.constant 0 : i32
    %c0_i32_1 = arith.constant 0 : i32
    return %c0_i32, %c0_i32_0 : i32, i32
  }
  func.func @transform_6(%arg0: i32) -> (i32, i32, i32) {
    %c0_i32 = arith.constant 0 : i32
    %c0_i32_0 = arith.constant 0 : i32
    %c0_i32_1 = arith.constant 0 : i32
    return %arg0, %c0_i32, %c0_i32_0 : i32, i32, i32
  }
}

</mosaic_0001>

<bundles_post_ra>
// kernel: tpu_custom_call.1
= control target key start
LH: loop header
LB: loop body
LE: loop exit
PB: predicated region body
PF: predicated region fallthrough
CT: control target
= control target key end

     0   :  { %11 = vsyncpa [#allocation3], 0  ;;  %s1416_s21 = smov 0   ;;  %s1855_s0 = inlined_call_operand.vmem [shape: bf16[2,8,256], index: 0, kind: input, shape index: {}]   ;;  %s1856_s1 = inlined_call_operand.vmem [shape: bf16[64,8], index: 1, kind: input, shape index: {}]   ;;  %s1857_s2 = inlined_call_operand.vmem [shape: bf16[64,64], index: 2, kind: input, shape index: {}]   ;;  %s1858_s3 = inlined_call_operand.hbm [shape: bf16[32,64], index: 3, kind: input, shape index: {}]   ;;  %s1859_s4 = inlined_call_operand.vmem [shape: bf16[5,32], index: 4, kind: input, shape index: {}]   ;;  %s1860_s5 = inlined_call_operand.vmem [shape: f32[5,1], index: 5, kind: input, shape index: {}]   ;;  %s1861_s6 = inlined_call_operand.vmem [shape: f32[2,5,256], index: 6, kind: output, shape index: {}]  }
   0x1 LB: > { %s1422_s22 = sadd.s32 4294967295, %s1375_s21   ;;  %p1225_p0 = scmp.ge.s32.totalorder %s1375_s21, 1  ;;  %s1375_s21 = sphi %s1416_s21, %s17_s21  }
   0x2   : > { %p179_p1 = scmp.lt.s32.totalorder %s1375_s21, 3  ;;  %s1377_s23 = smov [#allocation2]  }
   0x3   : > { %s197_s24 = sshll.u32 %s1377_s23, 4  ;;  %p1862_p3 = scmp.eq.s32.totalorder %s1422_s22, 0  ;;  %s198_s24 = int_to_ptr.vmem [resolvable:$true] %s197_s24 }
   0x4   : > { %p1426_p2 = pnand %p1225_p0, %p179_p1  ;;  %s1337_s29 = scalar_lea.hbm %s1858_s3, 256 }
   0x5   : > { %p1338_p6 = scmp.ne.s32.totalorder %s1858_s3, %s1337_s29  ;;  %p1344_p10 = scmp.lt.u32.totalorder %s1337_s29, %s1858_s3 }
   0x6   : > { %s1864_s25 = scalar_select %p1426_p2, 1, 0 }
   0x7   : > { %p1266_p4 = pneg %p1426_p2 }
   0x9   : > { %p1435_p5 = pnand %p1862_p3, %p1266_p4 }
   0xb   : > { %p1339_p7 = pneg %p1435_p5 }
   0xd   : > { %p1340_p8 = pnand %p1339_p7, %p1338_p6 }
   0xf   : > { %p1341_p9 = pneg %p1340_p8 }
  0x11   : > { %p1346_p11 = pnand %p1344_p10, %p1341_p9 }
  0x13   : > { %1349 = shalt.err (!%p1346_p11)
}
  0x14   : > { %s1350_s10 = scalar_lea.vmem %s198_s24, 256  ;;  %p1358_p1 = scmp.lt.s32.totalorder %s198_s24, %s198_s24 }
  0x15   : > { %p1351_p12 = scmp.ne.s32.totalorder %s198_s24, %s1350_s10  ;;  %p1359_p4 = scmp.lt.s32.totalorder %s1350_s10, %s1350_s10 }
  0x17   : > { %p1353_p13 = pnand %p1351_p12, %p1339_p7  ;;  %p1360_p3 = por %p1359_p4, %p1358_p1 }
  0x19   : > { %p1354_p0 = pneg %p1353_p13 }
  0x1b   : > { %p1361_p2 = pnand %p1360_p3, %p1354_p0 }
  0x1d   : > { %1364 = shalt.err (!%p1361_p2)
}
  0x1e   : > { %s1378_s11 = smov 64   ;;  %s1379_s12 = smov 4  }
  0x1f   : > { %1269 = dma.hbm_to_vmem [thread:$0]  (!%p1435_p5), %s1858_s3, 256, %s198_s24, [#allocation3], %s1378_s11, %s1378_s11, %s1379_s12  }
  0x20   : > { %p1866_p6 = scmp.ne.s32.totalorder %s1864_s25, 0 }
  0x21   : > { %p1867_p8 = scmp.eq.s32.totalorder (!%p1866_p6), %s1422_s22, 0 }
  0x22   : > { %227 = sbr.rel (%p1866_p6) target bundleno = 1505 (0x5e1), region = 44 }
  0x29   : > { %1370 = dma.done.wait (%p1867_p8), [#allocation3], 256   ;;  %p1868_p7 = pmov %p1867_p8 }
  0x2a   : > { %p257_p2 = scmp.lt.s32.totalorder %s1422_s22, 1  ;;  %v1380_v0 = vmov 0   ;;  %vm315_vm0 = vcmask 1043456   ;;  %v1287_v5 = vld [vmem:[%s1856_s1] sm:$0xff]   ;;  %vm302_vm1 = vcmask 64512   ;;  %v1288_v6 = vld [vmem:[%s1856_s1 + $0x8] sm:$0xff]  }
  0x2b   : > { %1372 = vsyncadd (%p1868_p7), [#allocation3], 4294967040  ;;  %354 = vmatprep.mubr.bf16.mxu0 %v1380_v0  ;;  %676 = vmatprep.mubr.bf16.mxu1 %v1380_v0  ;;  %v1289_v7 = vld [vmem:[%s1856_s1 + $0x10] sm:$0xff]   ;;  %v1290_v8 = vld [vmem:[%s1856_s1 + $0x18] sm:$0xff]  }
  0x2c   : > { %s1870_s22 = smov (!%p257_p2, %s1422_s22), 1  ;;  %1284 = vset.pattern.permute.xlu0 %v1380_v0 }
  0x2d   : > { %s1260_s15 = sshll.u32 %s1870_s22, 3  ;;  %s1261_s17 = sshll.u32 %s1870_s22, 4 }
  0x2e   : > { %s261_s18 = scalar_lea.vmem %s1855_s0, %s1260_s15  ;;  %s266_s20 = scalar_lea.vmem %s1861_s6, %s1261_s17 }
  0x2f   : > { %v276_v1 = vld [vmem:[%s261_s18] sm:$0xff] }
  0x30   : > { %v1239_v2 = vcombine.high %v276_v1, %v276_v1  ;;  %v1238_v3 = vcombine.low %v276_v1, %v276_v1 }
  0x32   : > { %1240 = vmatprep.subr.msk.bf16.mxu0 %vm315_vm0, %v1239_v2  ;;  %v317_v4 = vsel %vm315_vm0, %v1238_v3, 0 }
  0x33   : > { %323 = vmatpush1.bf16.msra.mxu0 %v317_v4 }
  0x36   : > { %1241 = vmatmul.mubr.msk.bf16.vlgmr.msra.gmra.mrb[0].mxu0 %vm302_vm1, %v1287_v5 }
  0x37   : > { %364 = vmatprep.mubr.bf16.mxu0 %v1380_v0 }
  0x3e   : > { %1242 = vmatmul.mubr.msk.bf16.gmra.mrb[4].mxu0 %vm302_vm1, %v1288_v6 }
  0x3f   : > { %374 = vmatprep.mubr.bf16.mxu0 %v1380_v0 }
  0x46   : > { %1243 = vmatmul.mubr.msk.bf16.gmra.mrb[8].mxu0 %vm302_vm1, %v1289_v7 }
  0x47   : > { %384 = vmatprep.mubr.bf16.mxu0 %v1380_v0 }
  0x4e   : > { %1244 = vmatmul.mubr.msk.bf16.gmra.mrb[12].mxu0 %vm302_vm1, %v1290_v8 }
  0x4f   : > { %977 = vmatprep.mubr.bf16.mxu0 %v1380_v0 }
 0x109   : > { %v1488_v9 = vpop.f32.mrb[0].mxu0 }
 0x10a   : > { %v1490_v10 = vpop.f32.mrb[1].mxu0  ;;  %v427_v11 = vmul.f32 %v1488_v9, %v1488_v9 }
 0x10b   : > { %v1494_v12 = vpop.f32.mrb[2].mxu0  ;;  %v395_v13 = vadd.f32 %v1490_v10, %v1488_v9  ;;  %v428_v14 = vmul.f32 %v1490_v10, %v1490_v10 }
 0x10c   : > { %v1500_v15 = vpop.f32.mrb[3].mxu0  ;;  %v429_v16 = vmul.f32 %v1494_v12, %v1494_v12 }
 0x10d   : > { %396 = vadd.xlane.f32.xlu0 %v395_v13  ;;  %v443_v17 = vadd.f32 %v428_v14, %v427_v11  ;;  %v398_v18 = vadd.f32 %v1500_v15, %v1494_v12  ;;  %v430_v19 = vmul.f32 %v1500_v15, %v1500_v15 }
 0x10f   : > { %444 = vadd.xlane.f32.xlu1 %v443_v17  ;;  %v446_v20 = vadd.f32 %v430_v19, %v429_v16 }
 0x111   : > { %399 = vadd.xlane.f32.xlu0 %v398_v18  ;;  %v1508_v21 = vpop.f32.mrb[4].mxu0 }
 0x112   : > { %v1510_v22 = vpop.f32.mrb[5].mxu0  ;;  %v431_v23 = vmul.f32 %v1508_v21, %v1508_v21 }
 0x113   : > { %447 = vadd.xlane.f32.xlu1 %v446_v20  ;;  %v1514_v24 = vpop.f32.mrb[6].mxu0  ;;  %v401_v25 = vadd.f32 %v1510_v22, %v1508_v21  ;;  %v432_v26 = vmul.f32 %v1510_v22, %v1510_v22 }
 0x114   : > { %v1520_v27 = vpop.f32.mrb[7].mxu0  ;;  %v433_v28 = vmul.f32 %v1514_v24, %v1514_v24 }
 0x115   : > { %402 = vadd.xlane.f32.xlu0 %v401_v25  ;;  %v404_v29 = vadd.f32 %v1520_v27, %v1514_v24  ;;  %v449_v30 = vadd.f32 %v432_v26, %v431_v23  ;;  %v434_v31 = vmul.f32 %v1520_v27, %v1520_v27 }
 0x117   : > { %405 = vadd.xlane.f32.xlu1 %v404_v29  ;;  %v452_v32 = vadd.f32 %v434_v31, %v433_v28 }
 0x119   : > { %450 = vadd.xlane.f32.xlu0 %v449_v30  ;;  %v1528_v33 = vpop.f32.mrb[8].mxu0 }
 0x11a   : > { %v1530_v34 = vpop.f32.mrb[9].mxu0  ;;  %v435_v35 = vmul.f32 %v1528_v33, %v1528_v33 }
 0x11b   : > { %453 = vadd.xlane.f32.xlu1 %v452_v32  ;;  %v1534_v36 = vpop.f32.mrb[10].mxu0  ;;  %v407_v37 = vadd.f32 %v1530_v34, %v1528_v33  ;;  %v436_v38 = vmul.f32 %v1530_v34, %v1530_v34 }
 0x11c   : > { %v1540_v39 = vpop.f32.mrb[11].mxu0  ;;  %v437_v40 = vmul.f32 %v1534_v36, %v1534_v36 }
 0x11d   : > { %408 = vadd.xlane.f32.xlu0 %v407_v37  ;;  %v410_v41 = vadd.f32 %v1540_v39, %v1534_v36  ;;  %v455_v42 = vadd.f32 %v436_v38, %v435_v35  ;;  %v438_v43 = vmul.f32 %v1540_v39, %v1540_v39 }
 0x11f   : > { %411 = vadd.xlane.f32.xlu1 %v410_v41  ;;  %v458_v44 = vadd.f32 %v438_v43, %v437_v40 }
 0x121   : > { %456 = vadd.xlane.f32.xlu0 %v455_v42  ;;  %v1548_v45 = vpop.f32.mrb[12].mxu0 }
 0x122   : > { %v1550_v46 = vpop.f32.mrb[13].mxu0  ;;  %v439_v47 = vmul.f32 %v1548_v45, %v1548_v45 }
 0x123   : > { %459 = vadd.xlane.f32.xlu1 %v458_v44  ;;  %v1554_v48 = vpop.f32.mrb[14].mxu0  ;;  %v413_v49 = vadd.f32 %v1550_v46, %v1548_v45  ;;  %v440_v50 = vmul.f32 %v1550_v46, %v1550_v46 }
 0x124   : > { %v1560_v51 = vpop.f32.mrb[15].mxu0  ;;  %v441_v52 = vmul.f32 %v1554_v48, %v1554_v48 }
 0x125   : > { %414 = vadd.xlane.f32.xlu0 %v413_v49  ;;  %v416_v53 = vadd.f32 %v1560_v51, %v1554_v48  ;;  %v461_v54 = vadd.f32 %v440_v50, %v439_v47  ;;  %v442_v55 = vmul.f32 %v1560_v51, %v1560_v51 }
 0x127   : > { %417 = vadd.xlane.f32.xlu1 %v416_v53  ;;  %v464_v56 = vadd.f32 %v442_v55, %v441_v52 }
 0x129   : > { %462 = vadd.xlane.f32.xlu0 %v461_v54 }
 0x12b   : > { %465 = vadd.xlane.f32.xlu1 %v464_v56 }
 0x19a   : > { %v397_v57 = vpop.xlane.xlu0 %396 }
 0x19b   : > { %v419_v58 = vmul.f32 0.00390625, %v397_v57 }
 0x19c   : > { %v445_v59 = vpop.xlane.xlu1 %444 }
 0x19d   : > { %v467_v60 = vmul.f32 0.00390625, %v445_v59  ;;  %v475_v61 = vmul.f32 %v419_v58, %v419_v58  ;;  %v499_v40 = vsub.f32 %v1488_v9, %v419_v58  ;;  %v500_v41 = vsub.f32 %v1490_v10, %v419_v58 }
 0x19e   : > { %v400_v62 = vpop.xlane.xlu0 %399 }
 0x19f   : > { %v483_v63 = vsub.f32 %v467_v60, %v475_v61  ;;  %v1568_v1 = vmul.f32 0.00390625, %v400_v62 }
 0x1a0   : > { %v448_v2 = vpop.xlane.xlu1 %447 }
 0x1a1   : > { %v491_v3 = vmax.f32 %v483_v63, 0.0  ;;  %v468_v4 = vmul.f32 0.00390625, %v448_v2  ;;  %v476_v5 = vmul.f32 %v1568_v1, %v1568_v1  ;;  %v501_v10 = vsub.f32 %v1494_v12, %v1568_v1 }
 0x1a2   : > { %v403_v6 = vpop.xlane.xlu0 %402  ;;  %v502_v57 = vsub.f32 %v1500_v15, %v1568_v1 }
 0x1a3   : > { %v515_v7 = vadd.f32 1e-05, %v491_v3  ;;  %v1572_v8 = vmul.f32 0.00390625, %v403_v6  ;;  %v484_v11 = vsub.f32 %v468_v4, %v476_v5 }
 0x1a4   : > { %v406_v13 = vpop.xlane.xlu1 %405 }
 0x1a5   : > { %1297 = vrsqrt.f32 %v515_v7  ;;  %v1574_v14 = vmul.f32 0.00390625, %v406_v13  ;;  %v492_v16 = vmax.f32 %v484_v11, 0.0  ;;  %v477_v18 = vmul.f32 %v1572_v8, %v1572_v8 }
 0x1a6   : > { %v451_v17 = vpop.xlane.xlu0 %450  ;;  %v503_v59 = vsub.f32 %v1508_v21, %v1572_v8  ;;  %v504_v2 = vsub.f32 %v1510_v22, %v1572_v8 }
 0x1a7   : > { %v469_v19 = vmul.f32 0.00390625, %v451_v17  ;;  %v516_v20 = vadd.f32 1e-05, %v492_v16  ;;  %v478_v26 = vmul.f32 %v1574_v14, %v1574_v14  ;;  %v505_v3 = vsub.f32 %v1514_v24, %v1574_v14 }
 0x1a8   : > { %v454_v23 = vpop.xlane.xlu1 %453  ;;  %v506_v12 = vsub.f32 %v1520_v27, %v1574_v14 }
 0x1a9   : > { %v485_v25 = vsub.f32 %v469_v19, %v477_v18  ;;  %v470_v28 = vmul.f32 0.00390625, %v454_v23  ;;  %1299 = vrsqrt.f32 %v516_v20 }
 0x1aa   : > { %v409_v29 = vpop.xlane.xlu0 %408 }
 0x1ab   : > { %v493_v30 = vmax.f32 %v485_v25, 0.0  ;;  %v486_v31 = vsub.f32 %v470_v28, %v478_v26  ;;  %v1580_v32 = vmul.f32 0.00390625, %v409_v29 }
 0x1ac   : > { %v412_v35 = vpop.xlane.xlu1 %411 }
 0x1ad   : > { %v517_v37 = vadd.f32 1e-05, %v493_v30  ;;  %v494_v38 = vmax.f32 %v486_v31, 0.0  ;;  %v1584_v42 = vmul.f32 0.00390625, %v412_v35  ;;  %v479_v49 = vmul.f32 %v1580_v32, %v1580_v32 }
 0x1ae   : > { %v457_v43 = vpop.xlane.xlu0 %456  ;;  %v507_v27 = vsub.f32 %v1528_v33, %v1580_v32 }
 0x1af   : > { %v1298_v44 = vpop.eup %1297  ;;  %1301 = vrsqrt.f32 %v517_v37  ;;  %v518_v47 = vadd.f32 1e-05, %v494_v38  ;;  %v471_v50 = vmul.f32 0.00390625, %v457_v43  ;;  %v480_v52 = vmul.f32 %v1584_v42, %v1584_v42 }
 0x1b0   : > { %v460_v53 = vpop.xlane.xlu1 %459  ;;  %v532_v54 = vmul.f32 %v1298_v44, %v500_v41  ;;  %v531_v56 = vmul.f32 %v1298_v44, %v499_v40 }
 0x1b1   : > { %1303 = vrsqrt.f32 %v518_v47  ;;  %v487_v55 = vsub.f32 %v471_v50, %v479_v49  ;;  %v472_v9 = vmul.f32 0.00390625, %v460_v53  ;;  %v508_v49 = vsub.f32 %v1530_v34, %v1580_v32 }
 0x1b2   : > { %v415_v58 = vpop.xlane.xlu0 %414  ;;  %v564_v15 = vmul.f32 0.01, %v532_v54  ;;  %vm548_vm2 = vcmp.ge.f32.partialorder %v532_v54, 0.0  ;;  %vm547_vm3 = vcmp.ge.f32.partialorder %v531_v56, 0.0  ;;  %v563_v13 = vmul.f32 0.01, %v531_v56 }
 0x1b3   : > { %v495_v60 = vmax.f32 %v487_v55, 0.0  ;;  %v488_v61 = vsub.f32 %v472_v9, %v480_v52  ;;  %v1596_v62 = vmul.f32 0.00390625, %v415_v58  ;;  %v1300_v63 = vpop.eup %1299  ;;  %v510_v34 = vsub.f32 %v1540_v39, %v1584_v42 }
 0x1b4   : > { %v418_v4 = vpop.xlane.xlu1 %417  ;;  %v534_v7 = vmul.f32 %v1300_v63, %v502_v57  ;;  %v533_v11 = vmul.f32 %v1300_v63, %v501_v10  ;;  %v580_v17 = vsel %vm548_vm2, %v532_v54, %v564_v15  ;;  %v579_v26 = vsel %vm547_vm3, %v531_v56, %v563_v13 }
 0x1b5   : > { %v519_v1 = vadd.f32 1e-05, %v495_v60  ;;  %v496_v5 = vmax.f32 %v488_v61, 0.0  ;;  %v1604_v21 = vmul.f32 0.00390625, %v418_v4  ;;  %v481_v24 = vmul.f32 %v1596_v62, %v1596_v62 }
 0x1b6   : > { %v463_v6 = vpop.xlane.xlu0 %462  ;;  %vm550_vm4 = vcmp.ge.f32.partialorder %v534_v7, 0.0  ;;  %v566_v23 = vmul.f32 0.01, %v534_v7  ;;  %vm549_vm5 = vcmp.ge.f32.partialorder %v533_v11, 0.0  ;;  %v565_v25 = vmul.f32 0.01, %v533_v11 }
 0x1b7   : > { %1305 = vrsqrt.f32 %v519_v1  ;;  %v520_v22 = vadd.f32 1e-05, %v496_v5  ;;  %v473_v8 = vmul.f32 0.00390625, %v463_v6  ;;  %v482_v14 = vmul.f32 %v1604_v21, %v1604_v21 }
 0x1b8   : > { %v466_v16 = vpop.xlane.xlu1 %465  ;;  %v582_v33 = vsel %vm550_vm4, %v534_v7, %v566_v23  ;;  %v581_v38 = vsel %vm549_vm5, %v533_v11, %v565_v25  ;;  %v509_v57 = vsub.f32 %v1534_v36, %v1584_v42  ;;  %v511_v42 = vsub.f32 %v1548_v45, %v1596_v62 }
 0x1b9   : > { %v1302_v18 = vpop.eup %1301  ;;  %1307 = vrsqrt.f32 %v520_v22  ;;  %v489_v19 = vsub.f32 %v473_v8, %v481_v24  ;;  %v474_v20 = vmul.f32 0.00390625, %v466_v16  ;;  %v604_v37 = vpack.c.bf16 %v582_v33, %v580_v17 }
 0x1ba   : > { %v536_v28 = vmul.f32 %v1302_v18, %v504_v2  ;;  %v535_v35 = vmul.f32 %v1302_v18, %v503_v59  ;;  %v603_v44 = vpack.c.bf16 %v581_v38, %v579_v26  ;;  %v512_v1 = vsub.f32 %v1550_v46, %v1596_v62 }
 0x1bb   : > { %v1304_v29 = vpop.eup %1303  ;;  %v497_v30 = vmax.f32 %v489_v19, 0.0  ;;  %v490_v31 = vsub.f32 %v474_v20, %v482_v14  ;;  %644 = vmatprep.subr.bf16.mxu1 %v604_v37  ;;  %v513_v11 = vsub.f32 %v1554_v48, %v1604_v21  ;;  %v514_v8 = vsub.f32 %v1560_v51, %v1604_v21 }
 0x1bc   : > { %v538_v40 = vmul.f32 %v1304_v29, %v506_v12  ;;  %vm552_vm6 = vcmp.ge.f32.partialorder %v536_v28, 0.0  ;;  %v568_v47 = vmul.f32 0.01, %v536_v28  ;;  %v537_v52 = vmul.f32 %v1304_v29, %v505_v3  ;;  %645 = vmatpush1.bf16.msra.mxu1 %v603_v44  ;;  %v1292_v29 = vld [vmem:[%s1857_s2 + $0x8] sm:$0xff]  }
 0x1bd   : > { %v521_v41 = vadd.f32 1e-05, %v497_v30  ;;  %v498_v43 = vmax.f32 %v490_v31, 0.0  ;;  %vm551_vm8 = vcmp.ge.f32.partialorder %v535_v35, 0.0  ;;  %v567_v54 = vmul.f32 0.01, %v535_v35 }
 0x1be   : > { %vm554_vm7 = vcmp.ge.f32.partialorder %v538_v40, 0.0  ;;  %v570_v50 = vmul.f32 0.01, %v538_v40  ;;  %v584_v55 = vsel %vm552_vm6, %v536_v28, %v568_v47  ;;  %vm553_vm9 = vcmp.ge.f32.partialorder %v537_v52, 0.0  ;;  %v1291_v28 = vld [vmem:[%s1857_s2] sm:$0xff]   ;;  %v1293_v30 = vld [vmem:[%s1857_s2 + $0x10] sm:$0xff]  }
 0x1bf   : > { %1309 = vrsqrt.f32 %v521_v41  ;;  %v522_v53 = vadd.f32 1e-05, %v498_v43  ;;  %v569_v56 = vmul.f32 0.01, %v537_v52  ;;  %v583_v58 = vsel %vm551_vm8, %v535_v35, %v567_v54  ;;  %v1294_v31 = vld [vmem:[%s1857_s2 + $0x18] sm:$0xff]  }
 0x1c0   : > { %v586_v9 = vsel %vm554_vm7, %v538_v40, %v570_v50  ;;  %vm631_vm2 = vcmask 523264  }
 0x1c1   : > { %v1306_v10 = vpop.eup %1305  ;;  %1311 = vrsqrt.f32 %v522_v53  ;;  %v606_v32 = vpack.c.bf16 %v586_v9, %v584_v55  ;;  %v585_v59 = vsel %vm553_vm9, %v537_v52, %v569_v56 }
 0x1c2   : > { %v540_v60 = vmul.f32 %v1306_v10, %v508_v49  ;;  %v539_v61 = vmul.f32 %v1306_v10, %v507_v27  ;;  %v605_v2 = vpack.c.bf16 %v585_v59, %v583_v58 }
 0x1c3   : > { %v1308_v63 = vpop.eup %1307  ;;  %646 = vmatprep.subr.bf16.mxu1 %v606_v32 }
 0x1c4   : > { %v542_v3 = vmul.f32 %v1308_v63, %v510_v34  ;;  %v572_v12 = vmul.f32 0.01, %v540_v60  ;;  %v541_v4 = vmul.f32 %v1308_v63, %v509_v57  ;;  %647 = vmatpush1.bf16.msra.mxu1 %v605_v2  ;;  %vm556_vm10 = vcmp.ge.f32.partialorder %v540_v60, 0.0 }
 0x1c5   : > { %v571_v15 = vmul.f32 0.01, %v539_v61  ;;  %vm555_vm12 = vcmp.ge.f32.partialorder %v539_v61, 0.0 }
 0x1c6   : > { %vm558_vm11 = vcmp.ge.f32.partialorder %v542_v3, 0.0  ;;  %v574_v36 = vmul.f32 0.01, %v542_v3  ;;  %vm557_vm13 = vcmp.ge.f32.partialorder %v541_v4, 0.0  ;;  %v573_v39 = vmul.f32 0.01, %v541_v4 }
 0x1c7   : > { %v588_v5 = vsel %vm556_vm10, %v540_v60, %v572_v12  ;;  %v587_v22 = vsel %vm555_vm12, %v539_v61, %v571_v15 }
 0x1c8   : > { %v590_v6 = vsel %vm558_vm11, %v542_v3, %v574_v36  ;;  %v589_v24 = vsel %vm557_vm13, %v541_v4, %v573_v39 }
 0x1c9   : > { %v1310_v7 = vpop.eup %1309  ;;  %v608_v13 = vpack.c.bf16 %v590_v6, %v588_v5  ;;  %v607_v27 = vpack.c.bf16 %v589_v24, %v587_v22 }
 0x1ca   : > { %v544_v14 = vmul.f32 %v1310_v7, %v512_v1  ;;  %v543_v16 = vmul.f32 %v1310_v7, %v511_v42 }
 0x1cb   : > { %v1312_v17 = vpop.eup %1311  ;;  %648 = vmatprep.subr.bf16.mxu1 %v608_v13 }
 0x1cc   : > { %649 = vmatpush1.bf16.msra.mxu1 %v607_v27  ;;  %v546_v45 = vmul.f32 %v1312_v17, %v514_v8  ;;  %v576_v46 = vmul.f32 0.01, %v544_v14  ;;  %v545_v62 = vmul.f32 %v1312_v17, %v513_v11  ;;  %vm560_vm14 = vcmp.ge.f32.partialorder %v544_v14, 0.0 }
 0x1cd   : > { %v575_v18 = vmul.f32 0.01, %v543_v16  ;;  %vm559_vm0 = vcmp.ge.f32.partialorder %v543_v16, 0.0 }
 0x1ce   : > { %vm562_vm15 = vcmp.ge.f32.partialorder %v546_v45, 0.0  ;;  %v578_v19 = vmul.f32 0.01, %v546_v45  ;;  %vm561_vm1 = vcmp.ge.f32.partialorder %v545_v62, 0.0  ;;  %v577_v48 = vmul.f32 0.01, %v545_v62 }
 0x1cf   : > { %v592_v20 = vsel %vm560_vm14, %v544_v14, %v576_v46  ;;  %v591_v51 = vsel %vm559_vm0, %v543_v16, %v575_v18 }
 0x1d0   : > { %v594_v23 = vsel %vm562_vm15, %v546_v45, %v578_v19  ;;  %v593_v21 = vsel %vm561_vm1, %v545_v62, %v577_v48 }
 0x1d1   : > { %v610_v25 = vpack.c.bf16 %v594_v23, %v592_v20  ;;  %v609_v26 = vpack.c.bf16 %v593_v21, %v591_v51 }
 0x1d3   : > { %650 = vmatprep.subr.bf16.mxu1 %v610_v25 }
 0x1d4   : > { %651 = vmatpush1.bf16.msra.mxu1 %v609_v26 }
 0x1d7   : > { %1249 = vmatmul.mubr.msk.bf16.vlgmr.msra.gmra.mrb[0].mxu1 %vm631_vm2, %v1291_v28 }
 0x1d8   : > { %686 = vmatprep.mubr.bf16.mxu1 %v1380_v0 }
 0x1df   : > { %1250 = vmatmul.mubr.msk.bf16.gmra.mrb[4].mxu1 %vm631_vm2, %v1292_v29 }
 0x1e0   : > { %696 = vmatprep.mubr.bf16.mxu1 %v1380_v0 }
 0x1e7   : > { %1251 = vmatmul.mubr.msk.bf16.gmra.mrb[8].mxu1 %vm631_vm2, %v1293_v30 }
 0x1e8   : > { %706 = vmatprep.mubr.bf16.mxu1 %v1380_v0 }
 0x1ef   : > { %1252 = vmatmul.mubr.msk.bf16.gmra.mrb[12].mxu1 %vm631_vm2, %v1294_v31 }
 0x1f0   : > { %1145 = vmatprep.mubr.bf16.mxu1 %v1380_v0 }
 0x2aa   : > { %v1647_v33 = vpop.f32.mrb[0].mxu1 }
 0x2ab   : > { %v1649_v35 = vpop.f32.mrb[1].mxu1  ;;  %v749_v37 = vmul.f32 %v1647_v33, %v1647_v33 }
 0x2ac   : > { %v1653_v38 = vpop.f32.mrb[2].mxu1  ;;  %v717_v40 = vadd.f32 %v1649_v35, %v1647_v33  ;;  %v750_v41 = vmul.f32 %v1649_v35, %v1649_v35 }
 0x2ad   : > { %v1659_v43 = vpop.f32.mrb[3].mxu1  ;;  %v751_v44 = vmul.f32 %v1653_v38, %v1653_v38 }
 0x2ae   : > { %718 = vadd.xlane.f32.xlu0 %v717_v40  ;;  %v720_v47 = vadd.f32 %v1659_v43, %v1653_v38  ;;  %v765_v49 = vadd.f32 %v750_v41, %v749_v37  ;;  %v752_v50 = vmul.f32 %v1659_v43, %v1659_v43 }
 0x2b0   : > { %721 = vadd.xlane.f32.xlu1 %v720_v47  ;;  %v768_v52 = vadd.f32 %v752_v50, %v751_v44 }
 0x2b2   : > { %766 = vadd.xlane.f32.xlu0 %v765_v49  ;;  %v1667_v53 = vpop.f32.mrb[4].mxu1 }
 0x2b3   : > { %v1669_v54 = vpop.f32.mrb[5].mxu1  ;;  %v753_v55 = vmul.f32 %v1667_v53, %v1667_v53 }
 0x2b4   : > { %769 = vadd.xlane.f32.xlu1 %v768_v52  ;;  %v1673_v9 = vpop.f32.mrb[6].mxu1  ;;  %v723_v56 = vadd.f32 %v1669_v54, %v1667_v53  ;;  %v754_v10 = vmul.f32 %v1669_v54, %v1669_v54 }
 0x2b5   : > { %v1679_v57 = vpop.f32.mrb[7].mxu1  ;;  %v755_v34 = vmul.f32 %v1673_v9, %v1673_v9 }
 0x2b6   : > { %724 = vadd.xlane.f32.xlu0 %v723_v56  ;;  %v726_v32 = vadd.f32 %v1679_v57, %v1673_v9  ;;  %v771_v58 = vadd.f32 %v754_v10, %v753_v55  ;;  %v756_v59 = vmul.f32 %v1679_v57, %v1679_v57 }
 0x2b8   : > { %727 = vadd.xlane.f32.xlu1 %v726_v32  ;;  %v774_v60 = vadd.f32 %v756_v59, %v755_v34 }
 0x2ba   : > { %772 = vadd.xlane.f32.xlu0 %v771_v58  ;;  %v1687_v61 = vpop.f32.mrb[8].mxu1 }
 0x2bb   : > { %v1689_v63 = vpop.f32.mrb[9].mxu1  ;;  %v757_v2 = vmul.f32 %v1687_v61, %v1687_v61 }
 0x2bc   : > { %775 = vadd.xlane.f32.xlu1 %v774_v60  ;;  %v1693_v3 = vpop.f32.mrb[10].mxu1  ;;  %v729_v12 = vadd.f32 %v1689_v63, %v1687_v61  ;;  %v758_v4 = vmul.f32 %v1689_v63, %v1689_v63 }
 0x2bd   : > { %v1699_v15 = vpop.f32.mrb[11].mxu1  ;;  %v759_v36 = vmul.f32 %v1693_v3, %v1693_v3 }
 0x2be   : > { %730 = vadd.xlane.f32.xlu0 %v729_v12  ;;  %v732_v39 = vadd.f32 %v1699_v15, %v1693_v3  ;;  %v777_v42 = vadd.f32 %v758_v4, %v757_v2  ;;  %v760_v1 = vmul.f32 %v1699_v15, %v1699_v15 }
 0x2c0   : > { %733 = vadd.xlane.f32.xlu1 %v732_v39  ;;  %v780_v5 = vadd.f32 %v760_v1, %v759_v36 }
 0x2c2   : > { %778 = vadd.xlane.f32.xlu0 %v777_v42  ;;  %v1707_v6 = vpop.f32.mrb[12].mxu1 }
 0x2c3   : > { %v1709_v7 = vpop.f32.mrb[13].mxu1  ;;  %v761_v11 = vmul.f32 %v1707_v6, %v1707_v6 }
 0x2c4   : > { %781 = vadd.xlane.f32.xlu1 %v780_v5  ;;  %v1713_v13 = vpop.f32.mrb[14].mxu1  ;;  %v735_v22 = vadd.f32 %v1709_v7, %v1707_v6  ;;  %v762_v24 = vmul.f32 %v1709_v7, %v1709_v7 }
 0x2c5   : > { %v1719_v8 = vpop.f32.mrb[15].mxu1  ;;  %v763_v27 = vmul.f32 %v1713_v13, %v1713_v13 }
 0x2c6   : > { %736 = vadd.xlane.f32.xlu0 %v735_v22  ;;  %v738_v14 = vadd.f32 %v1719_v8, %v1713_v13  ;;  %v783_v16 = vadd.f32 %v762_v24, %v761_v11  ;;  %v764_v17 = vmul.f32 %v1719_v8, %v1719_v8 }
 0x2c8   : > { %739 = vadd.xlane.f32.xlu1 %v738_v14  ;;  %v786_v45 = vadd.f32 %v764_v17, %v763_v27 }
 0x2ca   : > { %784 = vadd.xlane.f32.xlu0 %v783_v16 }
 0x2cc   : > { %787 = vadd.xlane.f32.xlu1 %v786_v45 }
 0x33b   : > { %v719_v46 = vpop.xlane.xlu0 %718 }
 0x33c   : > { %v1727_v62 = vmul.f32 0.00390625, %v719_v46 }
 0x33d   : > { %v722_v18 = vpop.xlane.xlu1 %721 }
 0x33e   : > { %v1729_v19 = vmul.f32 0.00390625, %v722_v18  ;;  %v797_v20 = vmul.f32 %v1727_v62, %v1727_v62  ;;  %v821_v11 = vsub.f32 %v1647_v33, %v1727_v62  ;;  %v822_v22 = vsub.f32 %v1649_v35, %v1727_v62 }
 0x33f   : > { %v767_v48 = vpop.xlane.xlu0 %766 }
 0x340   : > { %v789_v23 = vmul.f32 0.00390625, %v767_v48  ;;  %v798_v21 = vmul.f32 %v1729_v19, %v1729_v19  ;;  %v823_v45 = vsub.f32 %v1653_v38, %v1729_v19  ;;  %v824_v46 = vsub.f32 %v1659_v43, %v1729_v19 }
 0x341   : > { %v770_v25 = vpop.xlane.xlu1 %769 }
 0x342   : > { %v805_v51 = vsub.f32 %v789_v23, %v797_v20  ;;  %v790_v26 = vmul.f32 0.00390625, %v770_v25 }
 0x343   : > { %v725_v28 = vpop.xlane.xlu0 %724 }
 0x344   : > { %v813_v29 = vmax.f32 %v805_v51, 0.0  ;;  %v806_v30 = vsub.f32 %v790_v26, %v798_v21  ;;  %v1735_v31 = vmul.f32 0.00390625, %v725_v28 }
 0x345   : > { %v728_v37 = vpop.xlane.xlu1 %727 }
 0x346   : > { %v837_v40 = vadd.f32 1e-05, %v813_v29  ;;  %v814_v41 = vmax.f32 %v806_v30, 0.0  ;;  %v1737_v44 = vmul.f32 0.00390625, %v728_v37  ;;  %v799_v50 = vmul.f32 %v1735_v31, %v1735_v31 }
 0x347   : > { %v773_v47 = vpop.xlane.xlu0 %772  ;;  %v825_v33 = vsub.f32 %v1667_v53, %v1735_v31  ;;  %v826_v62 = vsub.f32 %v1669_v54, %v1735_v31 }
 0x348   : > { %1313 = vrsqrt.f32 %v837_v40  ;;  %v838_v49 = vadd.f32 1e-05, %v814_v41  ;;  %v791_v52 = vmul.f32 0.00390625, %v773_v47  ;;  %v800_v10 = vmul.f32 %v1737_v44, %v1737_v44 }
 0x349   : > { %v776_v55 = vpop.xlane.xlu1 %775  ;;  %v827_v51 = vsub.f32 %v1673_v9, %v1737_v44  ;;  %v828_v38 = vsub.f32 %v1679_v57, %v1737_v44 }
 0x34a   : > { %1315 = vrsqrt.f32 %v838_v49  ;;  %v807_v56 = vsub.f32 %v791_v52, %v799_v50  ;;  %v792_v34 = vmul.f32 0.00390625, %v776_v55 }
 0x34b   : > { %v731_v32 = vpop.xlane.xlu0 %730 }
 0x34c   : > { %v815_v58 = vmax.f32 %v807_v56, 0.0  ;;  %v808_v59 = vsub.f32 %v792_v34, %v800_v10  ;;  %v1743_v60 = vmul.f32 0.00390625, %v731_v32 }
 0x34d   : > { %v734_v2 = vpop.xlane.xlu1 %733 }
 0x34e   : > { %v839_v12 = vadd.f32 1e-05, %v815_v58  ;;  %v816_v4 = vmax.f32 %v808_v59, 0.0  ;;  %v1745_v36 = vmul.f32 0.00390625, %v734_v2  ;;  %v801_v1 = vmul.f32 %v1743_v60, %v1743_v60 }
 0x34f   : > { %v779_v39 = vpop.xlane.xlu0 %778  ;;  %v829_v57 = vsub.f32 %v1687_v61, %v1743_v60 }
 0x350   : > { %1317 = vrsqrt.f32 %v839_v12  ;;  %v840_v42 = vadd.f32 1e-05, %v816_v4  ;;  %v793_v5 = vmul.f32 0.00390625, %v779_v39  ;;  %v802_v16 = vmul.f32 %v1745_v36, %v1745_v36 }
 0x351   : > { %v782_v24 = vpop.xlane.xlu1 %781 }
 0x352   : > { %v1314_v27 = vpop.eup %1313  ;;  %1319 = vrsqrt.f32 %v840_v42  ;;  %v809_v14 = vsub.f32 %v793_v5, %v801_v1  ;;  %v794_v17 = vmul.f32 0.00390625, %v782_v24 }
 0x353   : > { %v737_v18 = vpop.xlane.xlu0 %736  ;;  %v854_v48 = vmul.f32 %v1314_v27, %v822_v22  ;;  %v853_v28 = vmul.f32 %v1314_v27, %v821_v11 }
 0x354   : > { %v1316_v35 = vpop.eup %1315  ;;  %v817_v20 = vmax.f32 %v809_v14, 0.0  ;;  %v810_v23 = vsub.f32 %v794_v17, %v802_v16  ;;  %v1763_v25 = vmul.f32 0.00390625, %v737_v18  ;;  %v830_v16 = vsub.f32 %v1689_v63, %v1743_v60 }
 0x355   : > { %v740_v43 = vpop.xlane.xlu1 %739  ;;  %v856_v19 = vmul.f32 %v1316_v35, %v824_v46  ;;  %v886_v21 = vmul.f32 0.01, %v854_v48  ;;  %vm870_vm3 = vcmp.ge.f32.partialorder %v854_v48, 0.0  ;;  %v855_v31 = vmul.f32 %v1316_v35, %v823_v45 }
 0x356   : > { %v841_v53 = vadd.f32 1e-05, %v817_v20  ;;  %v818_v26 = vmax.f32 %v810_v23, 0.0  ;;  %v1769_v29 = vmul.f32 0.00390625, %v740_v43  ;;  %v803_v9 = vmul.f32 %v1763_v25, %v1763_v25 }
 0x357   : > { %v785_v54 = vpop.xlane.xlu0 %784  ;;  %vm872_vm4 = vcmp.ge.f32.partialorder %v856_v19, 0.0  ;;  %v888_v30 = vmul.f32 0.01, %v856_v19  ;;  %v902_v47 = vsel %vm870_vm3, %v854_v48, %v886_v21  ;;  %vm869_vm5 = vcmp.ge.f32.partialorder %v853_v28, 0.0 }
 0x358   : > { %1321 = vrsqrt.f32 %v841_v53  ;;  %v842_v37 = vadd.f32 1e-05, %v818_v26  ;;  %v795_v40 = vmul.f32 0.00390625, %v785_v54  ;;  %v804_v41 = vmul.f32 %v1769_v29, %v1769_v29 }
 0x359   : > { %v788_v44 = vpop.xlane.xlu1 %787  ;;  %v904_v49 = vsel %vm872_vm4, %v856_v19, %v888_v30  ;;  %vm871_vm6 = vcmp.ge.f32.partialorder %v855_v31, 0.0  ;;  %v885_v10 = vmul.f32 0.01, %v853_v28  ;;  %v887_v34 = vmul.f32 0.01, %v855_v31 }
 0x35a   : > { %v1318_v50 = vpop.eup %1317  ;;  %1323 = vrsqrt.f32 %v842_v37  ;;  %v811_v52 = vsub.f32 %v795_v40, %v803_v9  ;;  %v796_v55 = vmul.f32 0.00390625, %v788_v44  ;;  %v922_v56 = vpack.c.bf16 %v904_v49, %v902_v47 }
 0x35b   : > { %v858_v61 = vmul.f32 %v1318_v50, %v826_v62  ;;  %v857_v2 = vmul.f32 %v1318_v50, %v825_v33  ;;  %v901_v12 = vsel %vm869_vm5, %v853_v28, %v885_v10  ;;  %v903_v4 = vsel %vm871_vm6, %v855_v31, %v887_v34  ;;  %v1295_v34 = vld [vmem:[#allocation2] sm:$0xff]  }
 0x35c   : > { %v1320_v32 = vpop.eup %1319  ;;  %v819_v58 = vmax.f32 %v811_v52, 0.0  ;;  %v812_v59 = vsub.f32 %v796_v55, %v804_v41  ;;  %945 = vmatprep.subr.bf16.mxu0 %v922_v56  ;;  %v921_v11 = vpack.c.bf16 %v903_v4, %v901_v12  ;;  %v831_v18 = vsub.f32 %v1693_v3, %v1745_v36 }
 0x35d   : > { %v860_v39 = vmul.f32 %v1320_v32, %v828_v38  ;;  %v859_v42 = vmul.f32 %v1320_v32, %v827_v51  ;;  %vm874_vm7 = vcmp.ge.f32.partialorder %v858_v61, 0.0  ;;  %v890_v22 = vmul.f32 0.01, %v858_v61  ;;  %v1296_v32 = vld [vmem:[#allocation2 + $0x8] sm:$0xff]  }
 0x35e   : > { %v843_v1 = vadd.f32 1e-05, %v819_v58  ;;  %v820_v5 = vmax.f32 %v812_v59, 0.0  ;;  %vm873_vm9 = vcmp.ge.f32.partialorder %v857_v2, 0.0  ;;  %946 = vmatpush1.bf16.msra.mxu0 %v921_v11  ;;  %v889_v14 = vmul.f32 0.01, %v857_v2 }
 0x35f   : > { %vm876_vm8 = vcmp.ge.f32.partialorder %v860_v39, 0.0  ;;  %v892_v24 = vmul.f32 0.01, %v860_v39  ;;  %vm875_vm10 = vcmp.ge.f32.partialorder %v859_v42, 0.0  ;;  %v906_v17 = vsel %vm874_vm7, %v858_v61, %v890_v22 }
 0x360   : > { %1325 = vrsqrt.f32 %v843_v1  ;;  %v844_v27 = vadd.f32 1e-05, %v820_v5  ;;  %v891_v46 = vmul.f32 0.01, %v859_v42  ;;  %v832_v48 = vsub.f32 %v1699_v15, %v1745_v36 }
 0x361   : > { %v908_v45 = vsel %vm876_vm8, %v860_v39, %v892_v24  ;;  %v905_v62 = vsel %vm873_vm9, %v857_v2, %v889_v14  ;;  %v833_v36 = vsub.f32 %v1707_v6, %v1763_v25  ;;  %v834_v53 = vsub.f32 %v1709_v7, %v1763_v25 }
 0x362   : > { %v1322_v33 = vpop.eup %1321  ;;  %1327 = vrsqrt.f32 %v844_v27  ;;  %v924_v35 = vpack.c.bf16 %v908_v45, %v906_v17  ;;  %v907_v20 = vsel %vm875_vm10, %v859_v42, %v891_v46  ;;  %v835_v30 = vsub.f32 %v1713_v13, %v1769_v29 }
 0x363   : > { %v862_v23 = vmul.f32 %v1322_v33, %v830_v16  ;;  %v861_v51 = vmul.f32 %v1322_v33, %v829_v57  ;;  %v923_v43 = vpack.c.bf16 %v907_v20, %v905_v62  ;;  %v836_v40 = vsub.f32 %v1719_v8, %v1769_v29  ;;  %v1103_v62 = vld [vmem:[%s1860_s5] sm:$0x1f] }
 0x364   : > { %v1324_v38 = vpop.eup %1323  ;;  %947 = vmatprep.subr.bf16.mxu0 %v924_v35 }
 0x365   : > { %v864_v63 = vmul.f32 %v1324_v38, %v832_v48  ;;  %v894_v60 = vmul.f32 0.01, %v862_v23  ;;  %v863_v19 = vmul.f32 %v1324_v38, %v831_v18  ;;  %948 = vmatpush1.bf16.msra.mxu0 %v923_v43  ;;  %vm878_vm11 = vcmp.ge.f32.partialorder %v862_v23, 0.0 }
 0x366   : > { %v893_v21 = vmul.f32 0.01, %v861_v51  ;;  %vm877_vm13 = vcmp.ge.f32.partialorder %v861_v51, 0.0 }
 0x367   : > { %vm880_vm12 = vcmp.ge.f32.partialorder %v864_v63, 0.0  ;;  %v896_v3 = vmul.f32 0.01, %v864_v63  ;;  %vm879_vm14 = vcmp.ge.f32.partialorder %v863_v19, 0.0  ;;  %v895_v15 = vmul.f32 0.01, %v863_v19 }
 0x368   : > { %v910_v26 = vsel %vm878_vm11, %v862_v23, %v894_v60  ;;  %v909_v37 = vsel %vm877_vm13, %v861_v51, %v893_v21  ;;  %vm1109_vm11 = vcmask 261120  }
 0x369   : > { %v912_v28 = vsel %vm880_vm12, %v864_v63, %v896_v3  ;;  %v911_v9 = vsel %vm879_vm14, %v863_v19, %v895_v15 }
 0x36a   : > { %v1326_v54 = vpop.eup %1325  ;;  %v926_v31 = vpack.c.bf16 %v912_v28, %v910_v26  ;;  %v925_v57 = vpack.c.bf16 %v911_v9, %v909_v37 }
 0x36b   : > { %v866_v41 = vmul.f32 %v1326_v54, %v834_v53  ;;  %v865_v44 = vmul.f32 %v1326_v54, %v833_v36 }
 0x36c   : > { %v1328_v47 = vpop.eup %1327  ;;  %949 = vmatprep.subr.bf16.mxu0 %v926_v31 }
 0x36d   : > { %950 = vmatpush1.bf16.msra.mxu0 %v925_v57  ;;  %v868_v6 = vmul.f32 %v1328_v47, %v836_v40  ;;  %v898_v7 = vmul.f32 0.01, %v866_v41  ;;  %v867_v25 = vmul.f32 %v1328_v47, %v835_v30  ;;  %vm882_vm15 = vcmp.ge.f32.partialorder %v866_v41, 0.0 }
 0x36e   : > { %v897_v49 = vmul.f32 0.01, %v865_v44  ;;  %vm881_vm1 = vcmp.ge.f32.partialorder %v865_v44, 0.0 }
 0x36f   : > { %vm884_vm0 = vcmp.ge.f32.partialorder %v868_v6, 0.0  ;;  %v900_v50 = vmul.f32 0.01, %v868_v6  ;;  %vm883_vm3 = vcmp.ge.f32.partialorder %v867_v25, 0.0  ;;  %v899_v13 = vmul.f32 0.01, %v867_v25 }
 0x370   : > { %v914_v52 = vsel %vm882_vm15, %v866_v41, %v898_v7  ;;  %v913_v8 = vsel %vm881_vm1, %v865_v44, %v897_v49 }
 0x371   : > { %v916_v55 = vsel %vm884_vm0, %v868_v6, %v900_v50  ;;  %v915_v29 = vsel %vm883_vm3, %v867_v25, %v899_v13 }
 0x372   : > { %v928_v56 = vpack.c.bf16 %v916_v55, %v914_v52  ;;  %v927_v10 = vpack.c.bf16 %v915_v29, %v913_v8 }
 0x374   : > { %951 = vmatprep.subr.bf16.mxu0 %v928_v56 }
 0x375   : > { %952 = vmatpush1.bf16.msra.mxu0 %v927_v10 }
 0x378   : > { %1255 = vmatmul.mubr.msk.bf16.vlgmr.msra.gmra.mrb[16].mxu0 %vm631_vm2, %v1295_v34 }
 0x379   : > { %987 = vmatprep.mubr.bf16.mxu0 %v1380_v0 }
 0x380   : > { %1256 = vmatmul.mubr.msk.bf16.gmra.mrb[20].mxu0 %vm631_vm2, %v1296_v32 }
 0x44b   : > { %v1794_v58 = vpop.f32.mrb[16].mxu0 }
 0x44c   : > { %v1796_v59 = vpop.f32.mrb[17].mxu0  ;;  %v1014_v61 = vmul.f32 %v1794_v58, %v1794_v58 }
 0x44d   : > { %v1800_v2 = vpop.f32.mrb[18].mxu0  ;;  %v998_v12 = vadd.f32 %v1796_v59, %v1794_v58  ;;  %v1015_v4 = vmul.f32 %v1796_v59, %v1796_v59 }
 0x44e   : > { %v1806_v39 = vpop.f32.mrb[19].mxu0  ;;  %v1016_v0 = vmul.f32 %v1800_v2, %v1800_v2 }
 0x44f   : > { %999 = vadd.xlane.f32.xlu0 %v998_v12  ;;  %v1001_v42 = vadd.f32 %v1806_v39, %v1800_v2  ;;  %v1022_v1 = vadd.f32 %v1015_v4, %v1014_v61  ;;  %v1017_v5 = vmul.f32 %v1806_v39, %v1806_v39 }
 0x451   : > { %1002 = vadd.xlane.f32.xlu1 %v1001_v42  ;;  %v1025_v11 = vadd.f32 %v1017_v5, %v1016_v0 }
 0x453   : > { %1023 = vadd.xlane.f32.xlu0 %v1022_v1  ;;  %v1814_v22 = vpop.f32.mrb[20].mxu0 }
 0x454   : > { %v1816_v24 = vpop.f32.mrb[21].mxu0  ;;  %v1018_v27 = vmul.f32 %v1814_v22, %v1814_v22 }
 0x455   : > { %1026 = vadd.xlane.f32.xlu1 %v1025_v11  ;;  %v1820_v14 = vpop.f32.mrb[22].mxu0  ;;  %v1004_v16 = vadd.f32 %v1816_v24, %v1814_v22  ;;  %v1019_v17 = vmul.f32 %v1816_v24, %v1816_v24 }
 0x456   : > { %v1826_v45 = vpop.f32.mrb[23].mxu0  ;;  %v1020_v46 = vmul.f32 %v1820_v14, %v1820_v14 }
 0x457   : > { %v1021_v33 = vmul.f32 %v1826_v45, %v1826_v45  ;;  %1005 = vadd.xlane.f32.xlu0 %v1004_v16  ;;  %v1007_v18 = vadd.f32 %v1826_v45, %v1820_v14  ;;  %v1028_v48 = vadd.f32 %v1019_v17, %v1018_v27 }
 0x459   : > { %1008 = vadd.xlane.f32.xlu1 %v1007_v18  ;;  %v1031_v35 = vadd.f32 %v1021_v33, %v1020_v46 }
 0x45b   : > { %1029 = vadd.xlane.f32.xlu0 %v1028_v48 }
 0x45d   : > { %1032 = vadd.xlane.f32.xlu1 %v1031_v35 }
 0x471   : > { %1106 = vperm.xlu0 %1284, %v1103_v62  }
 0x4dc   : > { %v1000_v20 = vpop.xlane.xlu0 %999 }
 0x4dd   : > { %v1010_v23 = vmul.f32 0.00390625, %v1000_v20 }
 0x4de   : > { %v1003_v51 = vpop.xlane.xlu1 %1002 }
 0x4df   : > { %v1011_v38 = vmul.f32 0.00390625, %v1003_v51  ;;  %v1038_v63 = vmul.f32 %v1010_v23, %v1010_v23  ;;  %v1050_v55 = vsub.f32 %v1794_v58, %v1010_v23  ;;  %v1051_v56 = vsub.f32 %v1796_v59, %v1010_v23 }
 0x4e0   : > { %v1024_v43 = vpop.xlane.xlu0 %1023 }
 0x4e1   : > { %v1034_v60 = vmul.f32 0.00390625, %v1024_v43  ;;  %v1039_v3 = vmul.f32 %v1011_v38, %v1011_v38  ;;  %v1052_v29 = vsub.f32 %v1800_v2, %v1011_v38  ;;  %v1053_v10 = vsub.f32 %v1806_v39, %v1011_v38 }
 0x4e2   : > { %v1027_v19 = vpop.xlane.xlu1 %1026 }
 0x4e3   : > { %v1042_v21 = vsub.f32 %v1034_v60, %v1038_v63  ;;  %v1035_v15 = vmul.f32 0.00390625, %v1027_v19 }
 0x4e4   : > { %v1006_v36 = vpop.xlane.xlu0 %1005 }
 0x4e5   : > { %v1046_v53 = vmax.f32 %v1042_v21, 0.0  ;;  %v1043_v26 = vsub.f32 %v1035_v15, %v1039_v3  ;;  %v1012_v28 = vmul.f32 0.00390625, %v1006_v36  ;;  %v1098_v21 = vld [vmem:[%s1859_s4] sm:$0x7] }
 0x4e6   : > { %v1009_v54 = vpop.xlane.xlu1 %1008 }
 0x4e7   : > { %v1058_v30 = vadd.f32 1e-05, %v1046_v53  ;;  %v1047_v31 = vmax.f32 %v1043_v26, 0.0  ;;  %v1013_v37 = vmul.f32 0.00390625, %v1009_v54  ;;  %v1040_v57 = vmul.f32 %v1012_v28, %v1012_v28 }
 0x4e8   : > { %v1030_v9 = vpop.xlane.xlu0 %1029  ;;  %v1054_v59 = vsub.f32 %v1814_v22, %v1012_v28  ;;  %v1055_v5 = vsub.f32 %v1816_v24, %v1012_v28 }
 0x4e9   : > { %1329 = vrsqrt.f32 %v1058_v30  ;;  %v1059_v40 = vadd.f32 1e-05, %v1047_v31  ;;  %v1036_v41 = vmul.f32 0.00390625, %v1030_v9  ;;  %v1041_v6 = vmul.f32 %v1013_v37, %v1013_v37 }
 0x4ea   : > { %v1033_v44 = vpop.xlane.xlu1 %1032  ;;  %v1056_v27 = vsub.f32 %v1820_v14, %v1013_v37  ;;  %v1057_v33 = vsub.f32 %v1826_v45, %v1013_v37 }
 0x4eb   : > { %1331 = vrsqrt.f32 %v1059_v40  ;;  %v1044_v47 = vsub.f32 %v1036_v41, %v1040_v57  ;;  %v1037_v7 = vmul.f32 0.00390625, %v1033_v44 }
 0x4ed   : > { %v1048_v25 = vmax.f32 %v1044_v47, 0.0  ;;  %v1045_v49 = vsub.f32 %v1037_v7, %v1041_v6 }
 0x4ef   : > { %v1060_v50 = vadd.f32 1e-05, %v1048_v25  ;;  %v1049_v13 = vmax.f32 %v1045_v49, 0.0 }
 0x4f0   : > { %v1107_v3 = vpop.permute.xlu0 %1106 }
 0x4f1   : > { %1333 = vrsqrt.f32 %v1060_v50  ;;  %v1061_v52 = vadd.f32 1e-05, %v1049_v13 }
 0x4f3   : > { %v1330_v8 = vpop.eup %1329  ;;  %1335 = vrsqrt.f32 %v1061_v52 }
 0x4f4   : > { %v1067_v34 = vmul.f32 %v1330_v8, %v1051_v56  ;;  %v1066_v32 = vmul.f32 %v1330_v8, %v1050_v55 }
 0x4f5   : > { %v1332_v61 = vpop.eup %1331 }
 0x4f6   : > { %v1069_v12 = vmul.f32 %v1332_v61, %v1053_v10  ;;  %v1083_v4 = vmul.f32 0.01, %v1067_v34  ;;  %v1068_v0 = vmul.f32 %v1332_v61, %v1052_v29  ;;  %vm1075_vm2 = vcmp.ge.f32.partialorder %v1067_v34, 0.0 }
 0x4f7   : > { %v1082_v42 = vmul.f32 0.01, %v1066_v32  ;;  %vm1074_vm5 = vcmp.ge.f32.partialorder %v1066_v32, 0.0 }
 0x4f8   : > { %vm1077_vm4 = vcmp.ge.f32.partialorder %v1069_v12, 0.0  ;;  %v1085_v1 = vmul.f32 0.01, %v1069_v12  ;;  %vm1076_vm6 = vcmp.ge.f32.partialorder %v1068_v0, 0.0  ;;  %v1084_v58 = vmul.f32 0.01, %v1068_v0 }
 0x4f9   : > { %v1091_v2 = vsel %vm1075_vm2, %v1067_v34, %v1083_v4  ;;  %v1090_v17 = vsel %vm1074_vm5, %v1066_v32, %v1082_v42 }
 0x4fa   : > { %v1093_v11 = vsel %vm1077_vm4, %v1069_v12, %v1085_v1  ;;  %v1092_v46 = vsel %vm1076_vm6, %v1068_v0, %v1084_v58 }
 0x4fb   : > { %v1334_v39 = vpop.eup %1333  ;;  %v1100_v16 = vpack.c.bf16 %v1093_v11, %v1091_v2  ;;  %v1099_v18 = vpack.c.bf16 %v1092_v46, %v1090_v17 }
 0x4fc   : > { %v1071_v48 = vmul.f32 %v1334_v39, %v1055_v5  ;;  %v1070_v35 = vmul.f32 %v1334_v39, %v1054_v59 }
 0x4fd   : > { %v1336_v62 = vpop.eup %1335  ;;  %1113 = vmatprep.subr.bf16.mxu1 %v1100_v16 }
 0x4fe   : > { %1114 = vmatpush1.bf16.msra.mxu1 %v1099_v18  ;;  %v1073_v20 = vmul.f32 %v1336_v62, %v1057_v33  ;;  %v1087_v22 = vmul.f32 0.01, %v1071_v48  ;;  %v1072_v23 = vmul.f32 %v1336_v62, %v1056_v27  ;;  %vm1079_vm7 = vcmp.ge.f32.partialorder %v1071_v48, 0.0 }
 0x4ff   : > { %v1086_v24 = vmul.f32 0.01, %v1070_v35  ;;  %vm1078_vm9 = vcmp.ge.f32.partialorder %v1070_v35, 0.0 }
 0x500   : > { %vm1081_vm8 = vcmp.ge.f32.partialorder %v1073_v20, 0.0  ;;  %v1089_v51 = vmul.f32 0.01, %v1073_v20  ;;  %vm1080_vm10 = vcmp.ge.f32.partialorder %v1072_v23, 0.0  ;;  %v1088_v14 = vmul.f32 0.01, %v1072_v23 }
 0x501   : > { %v1095_v38 = vsel %vm1079_vm7, %v1071_v48, %v1087_v22  ;;  %v1094_v63 = vsel %vm1078_vm9, %v1070_v35, %v1086_v24 }
 0x502   : > { %v1097_v43 = vsel %vm1081_vm8, %v1073_v20, %v1089_v51  ;;  %v1096_v60 = vsel %vm1080_vm10, %v1072_v23, %v1088_v14 }
 0x503   : > { %v1102_v45 = vpack.c.bf16 %v1097_v43, %v1095_v38  ;;  %v1101_v19 = vpack.c.bf16 %v1096_v60, %v1094_v63 }
 0x505   : > { %1115 = vmatprep.subr.bf16.mxu1 %v1102_v45 }
 0x506   : > { %1116 = vmatpush1.bf16.msra.mxu1 %v1101_v19 }
 0x509   : > { %1257 = vmatmul.mubr.msk.bf16.vlgmr.msra.gmra.mrb[16].mxu1 %vm1109_vm11, %v1098_v21 }
 0x5dc   : > { %v1147_v15 = vpop.f32.mrb[16].mxu1 }
 0x5dd   : > { %v1149_v36 = vpop.f32.mrb[17].mxu1  ;;  %v1148_v53 = vadd.f32 %v1147_v15, %v1107_v3 }
 0x5de   : > { %v1151_v26 = vpop.f32.mrb[18].mxu1  ;;  %v1150_v28 = vadd.f32 %v1149_v36, %v1107_v3 }
 0x5df   : > { %1154 = vst [vmem:[%s266_s20] sm:$0x1f] %v1148_v53  ;;  %v1152_v54 = vpop.f32.mrb[19].mxu1 }
 0x5e0   : > { %1155 = vst [vmem:[%s266_s20 + $0x8] sm:$0x1f] %v1150_v28 }
 0x5e1 PF: > { %s17_s21 = sadd.s32 1, %s1375_s21  }
 0x5e2   : > { %p14_p3 = scmp.ge.s32.totalorder %s17_s21, 4  }
 0x5e4   :  { %16 = sbr.rel (!%p14_p3) target bundleno = 1 (0x1), region = 79 }
 0x5eb   :  { %1177 = vsyncpa [#allocation3], 1 }
 0x5ec   :  { %1179 = vsyncpa [#allocation3 + $0x1], 1 }

</bundles_post_ra>
